<compile_context>
chip_gen: v5e
topology: v5e:2x2
jax: 0.10.0
libtpu: 0.0.40
codegen_flags: <defaults>
</compile_context>

<pallas_src>
import functools

import jax
import jax.numpy as jnp
from jax.experimental import pallas as pl
from jax.experimental.pallas import tpu as pltpu


def _round_up(x, m):
    return ((x + m - 1) // m) * m


def _policy_fc_kernel(w1_ref, b1_ref, w2_ref, b2_ref, w3_ref, b3_ref,
                      x_ref, out_ref):
    """One batch tile. x_ref is (d_in, bt): batch on the 128-wide lane axis."""
    x = x_ref[...]                                     # (d_in, bt), stream dtype

    # fc1 -> ReLU   (bf16 MXU inputs, f32 accumulation; biases kept in f32)
    a1 = jnp.maximum(
        jnp.dot(w1_ref[...], x, preferred_element_type=jnp.float32)
        + b1_ref[...], 0.0)                            # (16, bt) f32
    # fc2 -> ReLU
    a2 = jnp.maximum(
        jnp.dot(w2_ref[...], a1, preferred_element_type=jnp.float32)
        + b2_ref[...], 0.0)                            # (32, bt) f32
    # fc3 -> ReLU  (the PyTorch module applies ReLU before the softmax head)
    a3 = jnp.maximum(
        jnp.dot(w3_ref[...], a2, preferred_element_type=jnp.float32)
        + b3_ref[...], 0.0)                            # (n_actions, bt) f32

    # Numerically stable softmax over the action axis (sublane axis 0).
    m = jnp.max(a3, axis=0, keepdims=True)
    e = jnp.exp(a3 - m)
    denom = jnp.sum(e, axis=0, keepdims=True)
    # Exact divide (NOT approx reciprocal): rows must sum to 1 for sampling.
    out_ref[...] = (e / denom).astype(out_ref.dtype)


@functools.partial(jax.jit,
                   static_argnames=("b_tile", "stream_dtype", "out_dtype"))
def _forward_impl(state, w1, b1, w2, b2, w3, b3, *,
                  b_tile, stream_dtype, out_dtype):
    B, d_in = state.shape
    h1 = w1.shape[0]
    h2 = w2.shape[0]
    n_actions = w3.shape[0]

    # Lane tile: multiple of 128, as large as the padded batch allows.
    bt = max(128, min(_round_up(b_tile, 128), _round_up(B, 128)))
    Bp = _round_up(B, bt)

    # Lane-dense layout: batch on lanes.  Cast+transpose (+pad only if ragged)
    # fuse into a single XLA copy under jit; bf16 halves that pass's bytes.
    x_t = state.T.astype(stream_dtype)                 # (d_in, B)
    if Bp != B:
        x_t = jnp.pad(x_t, ((0, 0), (0, Bp - B)))      # zero pad -> no NaNs

    # Small, lane-compact parameter arrays; constant index_map => single DMA,
    # VMEM-resident across all batch tiles (no per-step slab slicing).
    params_flat = (
        w1.astype(stream_dtype), b1.reshape(h1, 1).astype(jnp.float32),
        w2.astype(stream_dtype), b2.reshape(h2, 1).astype(jnp.float32),
        w3.astype(stream_dtype), b3.reshape(n_actions, 1).astype(jnp.float32),
    )
    in_specs = [pl.BlockSpec(p.shape, lambda i: (0, 0)) for p in params_flat]
    in_specs.append(pl.BlockSpec((d_in, bt), lambda i: (0, i)))   # pipelined x

    out_t = pl.pallas_call(
        _policy_fc_kernel,
        out_shape=jax.ShapeDtypeStruct((n_actions, Bp), out_dtype),
        grid=(Bp // bt,),
        in_specs=in_specs,
        out_specs=pl.BlockSpec((n_actions, bt), lambda i: (0, i)),
        compiler_params=pltpu.CompilerParams(
            dimension_semantics=(pltpu.PARALLEL,)),
    )(*params_flat, x_t)

    # Back to PyTorch layout (B, n_actions); slice+transpose fuse under jit.
    return out_t[:, :B].T


def policy_network_fc_forward(state, params, *, b_tile=8192,
                              stream_dtype=jnp.bfloat16,
                              out_dtype=jnp.float32):
    """state: (B, D_in) float32 (PyTorch layout). Returns (B, n_actions) probs."""
    return _forward_impl(
        state, params["w1"], params["b1"], params["w2"], params["b2"],
        params["w3"], params["b3"],
        b_tile=b_tile, stream_dtype=stream_dtype, out_dtype=out_dtype)


def init_params(key, input_dim, n_actions):
    """nn.Linear-style U(-1/sqrt(fan_in), 1/sqrt(fan_in)) init, (out, in) layout."""
    dims = [(input_dim, 16), (16, 32), (32, n_actions)]
    params = {}
    for i, (fan_in, fan_out) in enumerate(dims, start=1):
        key, kw, kb = jax.random.split(key, 3)
        bound = float(1.0 / (fan_in ** 0.5))
        params[f"w{i}"] = jax.random.uniform(
            kw, (fan_out, fan_in), jnp.float32, -bound, bound)
        params[f"b{i}"] = jax.random.uniform(
            kb, (fan_out,), jnp.float32, -bound, bound)
    return params


def reference_forward(state, params):
    h1 = jnp.maximum(state @ params["w1"].T + params["b1"], 0.0)
    h2 = jnp.maximum(h1 @ params["w2"].T + params["b2"], 0.0)
    h3 = jnp.maximum(h2 @ params["w3"].T + params["b3"], 0.0)
    return jax.nn.softmax(h3, axis=-1)


if __name__ == "__main__":
    key = jax.random.PRNGKey(0)
    k_state, k_params, k_big = jax.random.split(key, 3)

    batch = 2
    input_dim = 4       # input_dims[0]
    n_actions = 8

    params = init_params(k_params, input_dim, n_actions)

    # Module-sized case (single grid step, padded to one 128-lane tile).
    state = jax.random.normal(k_state, (batch, input_dim), jnp.float32)
    actions = jax.block_until_ready(policy_network_fc_forward(state, params))
    ref = reference_forward(state, params)
    assert actions.shape == (batch, n_actions)
    assert jnp.allclose(actions, ref, atol=5e-3, rtol=2e-2)
    assert jnp.allclose(jnp.sum(actions, axis=-1), 1.0, atol=1e-4)

    # Larger batch (default big tile -> one step, bf16 streaming).
    state_big = jax.random.normal(k_big, (1000, input_dim), jnp.float32)
    actions_big = jax.block_until_ready(
        policy_network_fc_forward(state_big, params))
    ref_big = reference_forward(state_big, params)
    assert actions_big.shape == (1000, n_actions)
    assert jnp.allclose(actions_big, ref_big, atol=5e-3, rtol=2e-2)
    assert jnp.allclose(jnp.sum(actions_big, axis=-1), 1.0, atol=1e-4)

    # Multi-step batch grid (4 tiles of 256) exercises pipelined x tiles while
    # the constant-index params stay VMEM-resident.
    actions_tiled = jax.block_until_ready(
        policy_network_fc_forward(state_big, params, b_tile=256))
    assert jnp.allclose(actions_tiled, ref_big, atol=5e-3, rtol=2e-2)
    assert jnp.allclose(jnp.sum(actions_tiled, axis=-1), 1.0, atol=1e-4)

    # f32 streaming path: bitwise-tight against the pure-JAX reference.
    actions_f32 = jax.block_until_ready(
        policy_network_fc_forward(state_big, params,
                                  stream_dtype=jnp.float32))
    assert jnp.allclose(actions_f32, ref_big, atol=1e-5, rtol=1e-4)
    assert jnp.allclose(jnp.sum(actions_f32, axis=-1), 1.0, atol=1e-5)

    print("KERNEL_OK")
</pallas_src>

<mosaic_0001>
module attributes {stable_mosaic.version = 11 : i64} {
  func.func @_policy_fc_kernel(%arg0: i32, %arg1: memref<16x4xbf16, #tpu.memory_space<vmem>>, %arg2: memref<16x1xf32, #tpu.memory_space<vmem>>, %arg3: memref<32x16xbf16, #tpu.memory_space<vmem>>, %arg4: memref<32x1xf32, #tpu.memory_space<vmem>>, %arg5: memref<8x32xbf16, #tpu.memory_space<vmem>>, %arg6: memref<8x1xf32, #tpu.memory_space<vmem>>, %arg7: memref<4x128xbf16, #tpu.memory_space<vmem>>, %arg8: memref<8x128xf32, #tpu.memory_space<vmem>>) attributes {dimension_semantics = [#tpu.dimension_semantics<parallel>], iteration_bounds = array<i64: 1>, scalar_prefetch = 0 : i64, scratch_operands = 0 : i64, tpu.core_type = #tpu.core_type<tc>, window_params = [{pipeline_mode = #tpu.pipeline_mode<synchronous>, transform_indices = @transform_0, window_bounds = array<i64: 16, 4>}, {pipeline_mode = #tpu.pipeline_mode<synchronous>, transform_indices = @transform_1, window_bounds = array<i64: 16, 1>}, {pipeline_mode = #tpu.pipeline_mode<synchronous>, transform_indices = @transform_2, window_bounds = array<i64: 32, 16>}, {pipeline_mode = #tpu.pipeline_mode<synchronous>, transform_indices = @transform_3, window_bounds = array<i64: 32, 1>}, {pipeline_mode = #tpu.pipeline_mode<synchronous>, transform_indices = @transform_4, window_bounds = array<i64: 8, 32>}, {pipeline_mode = #tpu.pipeline_mode<synchronous>, transform_indices = @transform_5, window_bounds = array<i64: 8, 1>}, {transform_indices = @transform_6, window_bounds = array<i64: 4, 128>}, {transform_indices = @transform_7, window_bounds = array<i64: 8, 128>}]} {
    %c0 = arith.constant 0 : index
    %c0_0 = arith.constant 0 : index
    %0 = vector.load %arg7[%c0, %c0_0] : memref<4x128xbf16, #tpu.memory_space<vmem>>, vector<4x128xbf16>
    %c0_1 = arith.constant 0 : index
    %c0_2 = arith.constant 0 : index
    %1 = vector.load %arg1[%c0_1, %c0_2] : memref<16x4xbf16, #tpu.memory_space<vmem>>, vector<16x4xbf16>
    %cst = arith.constant dense<0.000000e+00> : vector<16x128xf32>
    %2 = tpu.matmul %1, %0, %cst {dimension_numbers = #tpu.dot_dimension_numbers<[1], [0], [0], [1], [0, 0, 1, 1], [], []>} : vector<16x4xbf16>, vector<4x128xbf16>, vector<16x128xf32> -> vector<16x128xf32>
    %c0_3 = arith.constant 0 : index
    %c0_4 = arith.constant 0 : index
    %3 = vector.load %arg2[%c0_3, %c0_4] : memref<16x1xf32, #tpu.memory_space<vmem>>, vector<16x1xf32>
    %4 = vector.broadcast %3 : vector<16x1xf32> to vector<16x128xf32>
    %5 = arith.addf %2, %4 : vector<16x128xf32>
    %cst_5 = arith.constant 0.000000e+00 : f32
    %6 = vector.broadcast %cst_5 : f32 to vector<16x128xf32>
    %7 = arith.maximumf %5, %6 : vector<16x128xf32>
    %c0_6 = arith.constant 0 : index
    %c0_7 = arith.constant 0 : index
    %8 = vector.load %arg3[%c0_6, %c0_7] : memref<32x16xbf16, #tpu.memory_space<vmem>>, vector<32x16xbf16>
    %cst_8 = arith.constant dense<0.000000e+00> : vector<32x128xf32>
    %9 = tpu.matmul %8, %7, %cst_8 {dimension_numbers = #tpu.dot_dimension_numbers<[1], [0], [0], [1], [0, 0, 1, 1], [], []>} : vector<32x16xbf16>, vector<16x128xf32>, vector<32x128xf32> -> vector<32x128xf32>
    %c0_9 = arith.constant 0 : index
    %c0_10 = arith.constant 0 : index
    %10 = vector.load %arg4[%c0_9, %c0_10] : memref<32x1xf32, #tpu.memory_space<vmem>>, vector<32x1xf32>
    %11 = vector.broadcast %10 : vector<32x1xf32> to vector<32x128xf32>
    %12 = arith.addf %9, %11 : vector<32x128xf32>
    %cst_11 = arith.constant 0.000000e+00 : f32
    %13 = vector.broadcast %cst_11 : f32 to vector<32x128xf32>
    %14 = arith.maximumf %12, %13 : vector<32x128xf32>
    %c0_12 = arith.constant 0 : index
    %c0_13 = arith.constant 0 : index
    %15 = vector.load %arg5[%c0_12, %c0_13] : memref<8x32xbf16, #tpu.memory_space<vmem>>, vector<8x32xbf16>
    %cst_14 = arith.constant dense<0.000000e+00> : vector<8x128xf32>
    %16 = tpu.matmul %15, %14, %cst_14 {dimension_numbers = #tpu.dot_dimension_numbers<[1], [0], [0], [1], [0, 0, 1, 1], [], []>} : vector<8x32xbf16>, vector<32x128xf32>, vector<8x128xf32> -> vector<8x128xf32>
    %c0_15 = arith.constant 0 : index
    %c0_16 = arith.constant 0 : index
    %17 = vector.load %arg6[%c0_15, %c0_16] : memref<8x1xf32, #tpu.memory_space<vmem>>, vector<8x1xf32>
    %18 = vector.broadcast %17 : vector<8x1xf32> to vector<8x128xf32>
    %19 = arith.addf %16, %18 : vector<8x128xf32>
    %cst_17 = arith.constant 0.000000e+00 : f32
    %20 = vector.broadcast %cst_17 : f32 to vector<8x128xf32>
    %21 = arith.maximumf %19, %20 : vector<8x128xf32>
    %cst_18 = arith.constant dense<0xFF800000> : vector<128xf32>
    %22 = vector.multi_reduction <maximumf>, %21, %cst_18 [0] : vector<8x128xf32> to vector<128xf32>
    %23 = vector.shape_cast %22 : vector<128xf32> to vector<1x128xf32>
    %24 = vector.broadcast %23 : vector<1x128xf32> to vector<8x128xf32>
    %25 = arith.subf %21, %24 : vector<8x128xf32>
    %26 = math.exp %25 : vector<8x128xf32>
    %cst_19 = arith.constant dense<0.000000e+00> : vector<128xf32>
    %27 = vector.multi_reduction <add>, %26, %cst_19 [0] : vector<8x128xf32> to vector<128xf32>
    %28 = vector.shape_cast %27 : vector<128xf32> to vector<1x128xf32>
    %29 = vector.broadcast %28 : vector<1x128xf32> to vector<8x128xf32>
    %30 = arith.divf %26, %29 : vector<8x128xf32>
    %c0_20 = arith.constant 0 : index
    %c0_21 = arith.constant 0 : index
    %31 = vector.load %arg8[%c0_20, %c0_21] : memref<8x128xf32, #tpu.memory_space<vmem>>, vector<8x128xf32>
    tpu.vector_store %arg8[%c0_20, %c0_21], %30 {strides = array<i32>} : memref<8x128xf32, #tpu.memory_space<vmem>>, vector<8x128xf32>,
    return
  }
  func.func @transform_0(%arg0: i32) -> (i32, i32) {
    %c0_i32 = arith.constant 0 : i32
    %c0_i32_0 = arith.constant 0 : i32
    %c0_i32_1 = arith.constant 0 : i32
    return %c0_i32, %c0_i32_0 : i32, i32
  }
  func.func @transform_1(%arg0: i32) -> (i32, i32) {
    %c0_i32 = arith.constant 0 : i32
    %c0_i32_0 = arith.constant 0 : i32
    %c0_i32_1 = arith.constant 0 : i32
    return %c0_i32, %c0_i32_0 : i32, i32
  }
  func.func @transform_2(%arg0: i32) -> (i32, i32) {
    %c0_i32 = arith.constant 0 : i32
    %c0_i32_0 = arith.constant 0 : i32
    %c0_i32_1 = arith.constant 0 : i32
    return %c0_i32, %c0_i32_0 : i32, i32
  }
  func.func @transform_3(%arg0: i32) -> (i32, i32) {
    %c0_i32 = arith.constant 0 : i32
    %c0_i32_0 = arith.constant 0 : i32
    %c0_i32_1 = arith.constant 0 : i32
    return %c0_i32, %c0_i32_0 : i32, i32
  }
  func.func @transform_4(%arg0: i32) -> (i32, i32) {
    %c0_i32 = arith.constant 0 : i32
    %c0_i32_0 = arith.constant 0 : i32
    %c0_i32_1 = arith.constant 0 : i32
    return %c0_i32, %c0_i32_0 : i32, i32
  }
  func.func @transform_5(%arg0: i32) -> (i32, i32) {
    %c0_i32 = arith.constant 0 : i32
    %c0_i32_0 = arith.constant 0 : i32
    %c0_i32_1 = arith.constant 0 : i32
    return %c0_i32, %c0_i32_0 : i32, i32
  }
  func.func @transform_6(%arg0: i32) -> (i32, i32) {
    %c0_i32 = arith.constant 0 : i32
    %c0_i32_0 = arith.constant 0 : i32
    return %c0_i32, %arg0 : i32, i32
  }
  func.func @transform_7(%arg0: i32) -> (i32, i32) {
    %c0_i32 = arith.constant 0 : i32
    %c0_i32_0 = arith.constant 0 : i32
    return %c0_i32, %arg0 : i32, i32
  }
}

</mosaic_0001>

<bundles_post_ra>
// kernel: _forward_impl.1
= control target key start
LH: loop header
LB: loop body
LE: loop exit
PB: predicated region body
PF: predicated region fallthrough
CT: control target
= control target key end

     0   :  { %vm51_vm0 = vcmask 1041408   ;;  %v244_v0 = vmov 0   ;;  %vm47_vm1 = vcmask 31744   ;;  %vm109_vm2 = vcmask 130048   ;;  %s324_s6 = inlined_call_operand.vmem [shape: bf16[4,128], index: 6, kind: input, shape index: {}]   ;;  %s325_s1 = inlined_call_operand.vmem [shape: f32[16,1], index: 1, kind: input, shape index: {}]   ;;  %s326_s0 = inlined_call_operand.vmem [shape: bf16[16,4], index: 0, kind: input, shape index: {}]   ;;  %s327_s5 = inlined_call_operand.vmem [shape: f32[8,1], index: 5, kind: input, shape index: {}]   ;;  %s328_s3 = inlined_call_operand.vmem [shape: f32[32,1], index: 3, kind: input, shape index: {}]   ;;  %s329_s2 = inlined_call_operand.vmem [shape: bf16[32,16], index: 2, kind: input, shape index: {}]   ;;  %s330_s4 = inlined_call_operand.vmem [shape: bf16[8,32], index: 4, kind: input, shape index: {}]   ;;  %s331_s7 = inlined_call_operand.vmem [shape: f32[8,128], index: 7, kind: output, shape index: {}]  }
   0x1   :  { %237 = vset.pattern.permute.xlu0 %v244_v0  ;;  %v27_v1 = vld [vmem:[%s324_s6] sm:$0x3]  ;;  %v31_v2 = vld [vmem:[%s325_s1 + $0x8] sm:$0xff]  ;;  %238 = vset.pattern.permute.xlu1 %v244_v0  ;;  %v78_v7 = vld [vmem:[%s328_s3 + $0x18] sm:$0xff]  ;;  %vm154_vm3 = vcmask 261120  }
   0x2   :  { %v53_v3 = vsel %vm51_vm0, %v27_v1, 0  ;;  %39 = vperm.xlu0 %237, %v31_v2   ;;  %v231_v4 = vld [vmem:[%s326_s0] sm:$0xff]  ;;  %239 = vset.pattern.permute.xlu2 %v244_v0  ;;  %v76_v8 = vld [vmem:[%s328_s3 + $0x8] sm:$0xff]  ;;  %v77_v9 = vld [vmem:[%s328_s3 + $0x10] sm:$0xff] }
   0x3   :  { %62 = vmatpush.bf16.msra.mxu0 %v53_v3  ;;  %v30_v5 = vld [vmem:[%s325_s1] sm:$0xff]  ;;  %96 = vperm.xlu1 %238, %v78_v7   ;;  %v233_v18 = vld [vmem:[%s329_s2 + $0x8] sm:$0xff] }
   0x4   :  { %v148_v6 = vld [vmem:[%s327_s5] sm:$0xff]  ;;  %86 = vperm.xlu2 %239, %v76_v8  }
   0x5   :  { %v75_v10 = vld [vmem:[%s328_s3] sm:$0xff] }
   0x6   :  { %219 = vmatmul.msk.bf16.vlgmr.msra.gmra.mxu0 %vm47_vm1, %v231_v4  ;;  %v232_v19 = vld [vmem:[%s329_s2] sm:$0xff] }
   0x7   :  { %v147_v37 = vld [vmem:[%s330_s4] sm:$0xf] }
   0xa   :  { %34 = vperm.xlu0 %237, %v30_v5  }
   0xb   :  { %91 = vperm.xlu1 %238, %v77_v9  }
   0xc   :  { %81 = vperm.xlu2 %239, %v75_v10  }
  0x12   :  { %151 = vperm.xlu0 %237, %v148_v6  }
  0x5e   :  { %v87_v23 = vpop.permute.xlu2 %86 }
  0x66   :  { %v82_v30 = vpop.permute.xlu2 %81 }
  0x74   :  { %v40_v11 = vpop.permute.xlu0 %39 }
  0x75   :  { %v97_v21 = vpop.permute.xlu1 %96 }
  0x7c   :  { %v35_v13 = vpop.permute.xlu0 %34 }
  0x7d   :  { %v92_v25 = vpop.permute.xlu1 %91 }
  0x83   :  { %v64_v12 = vpop.f32.mrf.mxu0 }
  0x84   :  { %v65_v15 = vadd.f32 %v64_v12, %v35_v13  ;;  %v152_v38 = vpop.permute.xlu0 %151 }
  0x86   :  { %v69_v20 = vmax.f32 %v65_v15, 0.0 }
  0x8b   :  { %v66_v14 = vpop.f32.mrf.mxu0 }
  0x8c   :  { %v67_v16 = vadd.f32 %v66_v14, %v40_v11 }
  0x8e   :  { %v70_v17 = vmax.f32 %v67_v16, 0.0 }
  0x90   :  { %130 = vmatpush.msra.mxu1 %v70_v17  ;;  %234 = vmatpush.msra.mxu3 %v70_v17 }
  0x92   :  { %131 = vmatpush.msra.mxu1 %v69_v20  ;;  %235 = vmatpush.msra.mxu3 %v69_v20 }
  0x93   :  { %229 = vmatmul.msk.bf16.vlgmr.msra.gmra.mxu3 %vm109_vm2, %v233_v18  ;;  %228 = vmatmul.msk.bf16.vlgmr.msra.gmra.mxu1 %vm109_vm2, %v232_v19 }
 0x110   :  { %v133_v22 = vpop.f32.mrf.mxu1 }
 0x111   :  { %v134_v34 = vadd.f32 %v133_v22, %v82_v30 }
 0x113   :  { %v143_v36 = vmax.f32 %v134_v34, 0.0 }
 0x116   :  { %v138_v24 = vpop.f32.mrf.mxu3 }
 0x117   :  { %v139_v28 = vadd.f32 %v138_v24, %v92_v25 }
 0x118   :  { %v135_v26 = vpop.f32.mrf.mxu1 }
 0x119   :  { %v136_v31 = vadd.f32 %v135_v26, %v87_v23  ;;  %v145_v33 = vmax.f32 %v139_v28, 0.0 }
 0x11b   :  { %v144_v35 = vmax.f32 %v136_v31, 0.0 }
 0x11e   :  { %v140_v27 = vpop.f32.mrf.mxu3 }
 0x11f   :  { %v141_v29 = vadd.f32 %v140_v27, %v97_v21 }
 0x121   :  { %v146_v32 = vmax.f32 %v141_v29, 0.0 }
 0x123   :  { %170 = vmatpush.msra.mxu2 %v146_v32 }
 0x125   :  { %171 = vmatpush.msra.mxu2 %v145_v33 }
 0x127   :  { %172 = vmatpush.msra.mxu2 %v144_v35 }
 0x129   :  { %173 = vmatpush.msra.mxu2 %v143_v36 }
 0x12a   :  { %230 = vmatmul.msk.bf16.vlgmr.msra.gmra.mxu2 %vm154_vm3, %v147_v37 }
 0x1ad   :  { %v175_v39 = vpop.f32.mrf.mxu2 }
 0x1ae   :  { %v176_v40 = vadd.f32 %v175_v39, %v152_v38 }
 0x1b0   :  { %v179_v41 = vmax.f32 %v176_v40, 0.0 }
 0x1b2   :  { %v180_v42 = vrot.slane %v179_v41, 4 }
 0x1b4   :  { %v181_v43 = vmax.f32 %v179_v41, %v180_v42 }
 0x1b5   :  { %v177_v44 = vpop.f32.mrf.mxu2 }
 0x1b6   :  { %v182_v45 = vrot.slane %v181_v43, 2 }
 0x1b8   :  { %v183_v46 = vmax.f32 %v181_v43, %v182_v45 }
 0x1ba   :  { %v184_v47 = vrot.slane %v183_v46, 1 }
 0x1bc   :  { %v185_v48 = vmax.f32 %v183_v46, %v184_v47 }
 0x1be   :  { %v186_v49 = vsub.f32 %v179_v41, %v185_v48 }
 0x1c0   :  { %v187_v50 = vmul.f32 1.442695, %v186_v49 }
 0x1c2   :  { %240 = vpow2.f32 %v187_v50 }
 0x1c8   :  { %v241_v51 = vpop.eup %240 }
 0x1c9   :  { %v189_v52 = vrot.slane %v241_v51, 4 }
 0x1cb   :  { %v190_v53 = vadd.f32 %v241_v51, %v189_v52 }
 0x1cd   :  { %v191_v54 = vrot.slane %v190_v53, 2 }
 0x1cf   :  { %v192_v55 = vadd.f32 %v191_v54, %v190_v53 }
 0x1d1   :  { %v193_v56 = vrot.slane %v192_v55, 1 }
 0x1d3   :  { %v194_v57 = vadd.f32 %v193_v56, %v192_v55 }
 0x1d5   :  { %242 = vrcp.f32 %v194_v57  ;;  %v206_v61 = vand.u32 2147483648, %v194_v57  ;;  %v204_v63 = vand.u32 2147483647, %v194_v57  ;;  %vm200_vm5 = vweird.f32 %v194_v57 }
 0x1d7   :  { %v207_v1 = vor.u32 1.1754944e-38, %v206_v61  ;;  %vm205_vm7 = vcmp.eq.f32.partialorder %v204_v63, 8.507059e+37 }
 0x1db   :  { %v243_v58 = vpop.eup %242 }
 0x1dc   :  { %v196_v59 = vmul.f32 %v243_v58, %v194_v57  ;;  %vm201_vm4 = vweird.f32 %v243_v58 }
 0x1dd   :  { %vm202_vm6 = vmor %vm200_vm5, %vm201_vm4 }
 0x1de   :  { %v197_v60 = vsub.f32 1.0, %v196_v59 }
 0x1e0   :  { %v198_v62 = vmul.f32 %v243_v58, %v197_v60 }
 0x1e2   :  { %v199_v0 = vadd.f32 %v243_v58, %v198_v62 }
 0x1e4   :  { %v203_v2 = vsel %vm202_vm6, %v243_v58, %v199_v0 }
 0x1e5   :  { %v208_v3 = vsel %vm205_vm7, %v207_v1, %v203_v2 }
 0x1e6   :  { %v209_v4 = vmul.f32 %v241_v51, %v208_v3 }
 0x1e8   :  { %210 = vst [vmem:[%s331_s7] sm:$0xff] %v209_v4 }

</bundles_post_ra>
